<compile_context>
chip_gen: v6e
topology: v6e:2x2x1
jax: 0.10.0
libtpu: 0.0.40
codegen_flags: <defaults>
</compile_context>

<pallas_src>
import functools

import jax
import jax.numpy as jnp
import numpy as np
from jax.experimental import pallas as pl
from jax.experimental.pallas import tpu as pltpu


_LANE = 128
_MAX_LANE_TILE = 2048  # cap on the lane tile (always a multiple of 128)


def _layernorm_kernel(*refs, eps, has_residual):
    if has_residual:
        x_ref, r_ref, g_ref, b_ref, o_ref = refs
    else:
        x_ref, g_ref, b_ref, o_ref = refs
        r_ref = None
    x = x_ref[...].astype(jnp.float32)          # (TB, C, TL)
    # Single-pass stats over the channel dim (axis=1): no (x - mean) temp
    # before the second reduction.
    m = jnp.mean(x, axis=1, keepdims=True)      # (TB, 1, TL)
    m2 = jnp.mean(x * x, axis=1, keepdims=True)
    var = jnp.maximum(m2 - m * m, 0.0)          # unbiased=False
    inv = jax.lax.rsqrt(var + eps)
    g = g_ref[...].astype(jnp.float32)          # (1, C, 1), broadcasts
    b = b_ref[...].astype(jnp.float32)
    y = (x - m) * inv * g + b
    if r_ref is not None:                       # fused elementwise epilogue
        y = y + r_ref[...].astype(jnp.float32)
    o_ref[...] = y.astype(o_ref.dtype)


def _vmem_budget():
    """Generation-aware (block-target-bytes, vmem-limit-bytes)."""
    try:
        cap = int(getattr(pltpu.get_tpu_info(), "vmem_capacity_bytes"))
    except Exception:
        cap = 64 * 1024 * 1024  # conservative fallback (v7x per-TC)
    # Explicit scoped-VMEM limit: well above the 16/32 MiB defaults, well
    # below physical capacity (96 MiB on 128 MiB chips, 48 MiB on v7x).
    vmem_limit = min(int(0.75 * cap), 96 * 1024 * 1024)
    # Block target: ~8 MiB on 128 MiB VMEM (v5e/v6e), ~4 MiB on 64 MiB (v7x).
    target_block = (8 if cap >= 96 * 1024 * 1024 else 4) * 1024 * 1024
    return target_block, vmem_limit


def _choose_tiles(B, C, L, itemsize, target_block_bytes):
    # Lane tile: multiple of 128, capped; full L only when L < 128.
    if L <= _LANE:
        TL = L
    else:
        TL = (min(L, _MAX_LANE_TILE) // _LANE) * _LANE
    # Batch tile: grow toward the target block size. cdiv grid masks the edge
    # block, so no divisibility requirement on B (no TB=1 degradation).
    row_bytes = max(C * TL * itemsize, 1)
    TB = int(max(1, min(B, target_block_bytes // row_bytes)))
    grid = (pl.cdiv(B, TB), pl.cdiv(L, TL))
    # v7x megacore: keep >= 2 parallel blocks when possible so both
    # TensorCores get work (free on single-TC v5e/v6e).
    if grid[0] * grid[1] == 1 and B > 1:
        TB = pl.cdiv(B, 2)
        grid = (pl.cdiv(B, TB), grid[1])
    return TB, TL, grid


def layer_norm(x, g, b, *, eps=1e-5, residual=None):
    """LayerNorm over dim=1 of a [B, C, L] tensor (torch semantics).

    If `residual` (same shape as x) is given it is added to the normalized
    output *inside* the kernel (fused epilogue, one less HBM round-trip).
    """
    B, C, L = x.shape
    assert g.shape == (1, C, 1) and b.shape == (1, C, 1)
    has_residual = residual is not None

    target_block, vmem_limit = _vmem_budget()
    TB, TL, grid = _choose_tiles(B, C, L, x.dtype.itemsize, target_block)

    data_spec = pl.BlockSpec((TB, C, TL), lambda i, j: (i, 0, j))
    # Constant index_map -> Pallas keeps g/b resident across grid steps.
    param_spec = pl.BlockSpec((1, C, 1), lambda i, j: (0, 0, 0))

    in_specs = [data_spec]
    operands = [x]
    if has_residual:
        in_specs.append(data_spec)
        operands.append(residual)
    in_specs += [param_spec, param_spec]
    operands += [g, b]

    nbytes = B * C * L * x.dtype.itemsize
    cost = pl.CostEstimate(
        flops=8 * B * C * L,
        transcendentals=B * L,
        bytes_accessed=(2 + int(has_residual)) * nbytes + 2 * C * 4,
    )

    return pl.pallas_call(
        functools.partial(_layernorm_kernel, eps=float(eps),
                          has_residual=has_residual),
        out_shape=jax.ShapeDtypeStruct((B, C, L), x.dtype),
        grid_spec=pltpu.PrefetchScalarGridSpec(
            num_scalar_prefetch=0,
            grid=grid,
            in_specs=in_specs,
            out_specs=data_spec,
        ),
        compiler_params=pltpu.CompilerParams(
            dimension_semantics=("parallel", "parallel"),
            vmem_limit_bytes=vmem_limit),
        cost_estimate=cost,
    )(*operands)


def residual_add(y, a):
    """Common PreNorm `fn`: elementwise residual add (kernel-fusable)."""
    return y + a


def pre_norm(x, g, b, fn, *args, eps=1e-5):
    """PreNorm.forward: fn(LayerNorm(x), *args).

    Matches the PyTorch reference: only x is normalized, extra args are passed
    to fn untouched.  When fn is `residual_add` with one same-shaped arg the
    add is fused into the LayerNorm kernel.
    """
    if (fn is residual_add and len(args) == 1
            and hasattr(args[0], "shape") and args[0].shape == x.shape):
        return layer_norm(x, g, b, eps=eps, residual=args[0])
    # TODO(synk): arbitrary user `fn` has no generic Pallas equivalent; it is
    #             applied in plain JAX outside the kernel.
    return fn(layer_norm(x, g, b, eps=eps), *args)


def _ref_layernorm(x, g, b, eps=1e-5):
    mean = x.mean(axis=1, keepdims=True)
    var = x.var(axis=1, keepdims=True)          # ddof=0 == unbiased=False
    return (x - mean) / np.sqrt(var + eps) * g + b


if __name__ == "__main__":
    key = jax.random.PRNGKey(0)
    k1, k2, k3, k4 = jax.random.split(key, 4)
    ok = True

    # Primary small example: [batch=2, channels=32, seq=128].
    B, C, L = 2, 32, 128
    x = jax.random.normal(k1, (B, C, L), dtype=jnp.float32)
    extra = jax.random.normal(k2, (B, C, L), dtype=jnp.float32)
    g = 1.0 + 0.1 * jax.random.normal(k3, (1, C, 1), dtype=jnp.float32)
    b = 0.1 * jax.random.normal(k4, (1, C, 1), dtype=jnp.float32)

    # Fused path (fn == residual_add -> add happens inside the kernel).
    out_fused = jax.block_until_ready(pre_norm(x, g, b, residual_add, extra))
    # Generic-fn path (fn applied in plain JAX after the kernel).
    out_plain = jax.block_until_ready(
        pre_norm(x, g, b, lambda y, a: y + a, extra))

    ref = _ref_layernorm(np.asarray(x), np.asarray(g), np.asarray(b)) \
        + np.asarray(extra)
    ok &= bool(np.allclose(np.asarray(out_fused), ref, rtol=1e-5, atol=1e-5))
    ok &= bool(np.allclose(np.asarray(out_plain), ref, rtol=1e-5, atol=1e-5))

    # Edge-block coverage: odd batch, L not a multiple of 128 (cdiv grid).
    B2, C2, L2 = 3, 8, 200
    x2 = jax.random.normal(k2, (B2, C2, L2), dtype=jnp.float32)
    g2 = jnp.ones((1, C2, 1), dtype=jnp.float32)
    b2 = jnp.zeros((1, C2, 1), dtype=jnp.float32)
    out2 = jax.block_until_ready(layer_norm(x2, g2, b2))
    ref2 = _ref_layernorm(np.asarray(x2), np.asarray(g2), np.asarray(b2))
    ok &= bool(np.allclose(np.asarray(out2), ref2, rtol=1e-5, atol=1e-5))

    if ok:
        print("KERNEL_OK")
    else:
        print("MISMATCH")
</pallas_src>

<mosaic_0001>
module attributes {stable_mosaic.version = 11 : i64} {
  func.func @_layernorm_kernel(%arg0: i32, %arg1: i32, %arg2: memref<1x32x128xf32, #tpu.memory_space<vmem>>, %arg3: memref<1x32x128xf32, #tpu.memory_space<vmem>>, %arg4: memref<1x32x1xf32, #tpu.memory_space<vmem>>, %arg5: memref<1x32x1xf32, #tpu.memory_space<vmem>>, %arg6: memref<1x32x128xf32, #tpu.memory_space<vmem>>) attributes {dimension_semantics = [#tpu.dimension_semantics<parallel>, #tpu.dimension_semantics<parallel>], iteration_bounds = array<i64: 2, 1>, scalar_prefetch = 0 : i64, scratch_operands = 0 : i64, tpu.core_type = #tpu.core_type<tc>, window_params = [{transform_indices = @transform_0, window_bounds = array<i64: 1, 32, 128>}, {transform_indices = @transform_1, window_bounds = array<i64: 1, 32, 128>}, {pipeline_mode = #tpu.pipeline_mode<synchronous>, transform_indices = @transform_2, window_bounds = array<i64: 1, 32, 1>}, {pipeline_mode = #tpu.pipeline_mode<synchronous>, transform_indices = @transform_3, window_bounds = array<i64: 1, 32, 1>}, {transform_indices = @transform_4, window_bounds = array<i64: 1, 32, 128>}]} {
    %c0 = arith.constant 0 : index
    %c0_0 = arith.constant 0 : index
    %c0_1 = arith.constant 0 : index
    %0 = vector.load %arg2[%c0, %c0_0, %c0_1] : memref<1x32x128xf32, #tpu.memory_space<vmem>>, vector<1x32x128xf32>
    %cst = arith.constant dense<0.000000e+00> : vector<1x128xf32>
    %1 = vector.multi_reduction <add>, %0, %cst [1] : vector<1x32x128xf32> to vector<1x128xf32>
    %2 = vector.shape_cast %1 : vector<1x128xf32> to vector<1x1x128xf32>
    %cst_2 = arith.constant 3.200000e+01 : f32
    %3 = vector.broadcast %cst_2 : f32 to vector<1x1x128xf32>
    %4 = arith.divf %2, %3 : vector<1x1x128xf32>
    %5 = arith.mulf %0, %0 : vector<1x32x128xf32>
    %cst_3 = arith.constant dense<0.000000e+00> : vector<1x128xf32>
    %6 = vector.multi_reduction <add>, %5, %cst_3 [1] : vector<1x32x128xf32> to vector<1x128xf32>
    %7 = vector.shape_cast %6 : vector<1x128xf32> to vector<1x1x128xf32>
    %cst_4 = arith.constant 3.200000e+01 : f32
    %8 = vector.broadcast %cst_4 : f32 to vector<1x1x128xf32>
    %9 = arith.divf %7, %8 : vector<1x1x128xf32>
    %10 = arith.mulf %4, %4 : vector<1x1x128xf32>
    %11 = arith.subf %9, %10 : vector<1x1x128xf32>
    %cst_5 = arith.constant 0.000000e+00 : f32
    %12 = vector.broadcast %cst_5 : f32 to vector<1x1x128xf32>
    %13 = arith.maximumf %11, %12 : vector<1x1x128xf32>
    %cst_6 = arith.constant 9.99999974E-6 : f32
    %14 = vector.broadcast %cst_6 : f32 to vector<1x1x128xf32>
    %15 = arith.addf %13, %14 : vector<1x1x128xf32>
    %16 = math.rsqrt %15 : vector<1x1x128xf32>
    %c0_7 = arith.constant 0 : index
    %c0_8 = arith.constant 0 : index
    %c0_9 = arith.constant 0 : index
    %17 = vector.load %arg4[%c0_7, %c0_8, %c0_9] : memref<1x32x1xf32, #tpu.memory_space<vmem>>, vector<1x32x1xf32>
    %c0_10 = arith.constant 0 : index
    %c0_11 = arith.constant 0 : index
    %c0_12 = arith.constant 0 : index
    %18 = vector.load %arg5[%c0_10, %c0_11, %c0_12] : memref<1x32x1xf32, #tpu.memory_space<vmem>>, vector<1x32x1xf32>
    %19 = vector.broadcast %4 : vector<1x1x128xf32> to vector<1x32x128xf32>
    %20 = arith.subf %0, %19 : vector<1x32x128xf32>
    %21 = vector.broadcast %16 : vector<1x1x128xf32> to vector<1x32x128xf32>
    %22 = arith.mulf %20, %21 : vector<1x32x128xf32>
    %23 = vector.broadcast %17 : vector<1x32x1xf32> to vector<1x32x128xf32>
    %24 = arith.mulf %22, %23 : vector<1x32x128xf32>
    %25 = vector.broadcast %18 : vector<1x32x1xf32> to vector<1x32x128xf32>
    %26 = arith.addf %24, %25 : vector<1x32x128xf32>
    %c0_13 = arith.constant 0 : index
    %c0_14 = arith.constant 0 : index
    %c0_15 = arith.constant 0 : index
    %27 = vector.load %arg3[%c0_13, %c0_14, %c0_15] : memref<1x32x128xf32, #tpu.memory_space<vmem>>, vector<1x32x128xf32>
    %28 = arith.addf %26, %27 : vector<1x32x128xf32>
    %c0_16 = arith.constant 0 : index
    %c0_17 = arith.constant 0 : index
    %c0_18 = arith.constant 0 : index
    %29 = vector.load %arg6[%c0_16, %c0_17, %c0_18] : memref<1x32x128xf32, #tpu.memory_space<vmem>>, vector<1x32x128xf32>
    tpu.vector_store %arg6[%c0_16, %c0_17, %c0_18], %28 {strides = array<i32>} : memref<1x32x128xf32, #tpu.memory_space<vmem>>, vector<1x32x128xf32>,
    return
  }
  func.func @transform_0(%arg0: i32, %arg1: i32) -> (i32, i32, i32) {
    %c0_i32 = arith.constant 0 : i32
    %c0_i32_0 = arith.constant 0 : i32
    return %arg0, %c0_i32, %arg1 : i32, i32, i32
  }
  func.func @transform_1(%arg0: i32, %arg1: i32) -> (i32, i32, i32) {
    %c0_i32 = arith.constant 0 : i32
    %c0_i32_0 = arith.constant 0 : i32
    return %arg0, %c0_i32, %arg1 : i32, i32, i32
  }
  func.func @transform_2(%arg0: i32, %arg1: i32) -> (i32, i32, i32) {
    %c0_i32 = arith.constant 0 : i32
    %c0_i32_0 = arith.constant 0 : i32
    %c0_i32_1 = arith.constant 0 : i32
    %c0_i32_2 = arith.constant 0 : i32
    return %c0_i32, %c0_i32_0, %c0_i32_1 : i32, i32, i32
  }
  func.func @transform_3(%arg0: i32, %arg1: i32) -> (i32, i32, i32) {
    %c0_i32 = arith.constant 0 : i32
    %c0_i32_0 = arith.constant 0 : i32
    %c0_i32_1 = arith.constant 0 : i32
    %c0_i32_2 = arith.constant 0 : i32
    return %c0_i32, %c0_i32_0, %c0_i32_1 : i32, i32, i32
  }
  func.func @transform_4(%arg0: i32, %arg1: i32) -> (i32, i32, i32) {
    %c0_i32 = arith.constant 0 : i32
    %c0_i32_0 = arith.constant 0 : i32
    return %arg0, %c0_i32, %arg1 : i32, i32, i32
  }
}

</mosaic_0001>

<bundles_post_ra>
// kernel: tpu_custom_call.1
= control target key start
LH: loop header
LB: loop body
LE: loop exit
PB: predicated region body
PF: predicated region fallthrough
CT: control target
= control target key end

     0   :  { %9 = vsyncpa [#allocation3], 0  ;;  %s910_s0 = inlined_call_operand.vmem [shape: f32[2,32,128], index: 0, kind: input, shape index: {}]   ;;  %s911_s1 = inlined_call_operand.hbm [shape: f32[2,32,128], index: 1, kind: input, shape index: {}]   ;;  %s912_s2 = inlined_call_operand.vmem [shape: f32[1,32,1], index: 2, kind: input, shape index: {}]   ;;  %s913_s3 = inlined_call_operand.vmem [shape: f32[1,32,1], index: 3, kind: input, shape index: {}]   ;;  %s914_s4 = inlined_call_operand.hbm [shape: f32[2,32,128], index: 4, kind: output, shape index: {}]  }
   0x1   :  { %11 = vsyncpa [#allocation3 + $0x1], 0 }
   0x2   :  { %12 = vsyncpa [#allocation4], 0 }
   0x3   :  { %14 = vsyncpa [#allocation4 + $0x1], 0  ;;  %s725_s15 = smov 0   ;;  %s727_s16 = smov 0  }
   0x4   :  { %s729_s17 = smov 0   ;;  %s731_s18 = smov 0  }
   0x5   :  { %s733_s19 = smov 0   ;;  %s735_s20 = smov 0  }
   0x6 LB: > { %s492_s21 = sadd.s32 4294967295, %s691_s20   ;;  %s493_s22 = sadd.s32 4294967294, %s691_s20   ;;  %s691_s20 = sphi %s735_s20, %s20_s20   ;;  %s687_s19 = sphi %s733_s19, %s925_s19   ;;  %s683_s18 = sphi %s731_s18, %s924_s18   ;;  %s679_s17 = sphi %s729_s17, %s923_s17   ;;  %s675_s16 = sphi %s727_s16, %s922_s16   ;;  %s671_s15 = sphi %s725_s15, %s921_s15  }
   0x7   : > { %s32_s23 = sadd.s32 1, %s687_s19  ;;  %s69_s24 = sadd.s32 1, %s679_s17 }
   0x8   : > { %p34_p0 = scmp.ge.s32.totalorder %s32_s23, 2  ;;  %p76_p1 = scmp.ne.s32.totalorder %s679_s17, %s675_s16 }
   0x9   : > { %p77_p2 = scmp.eq.s32.totalorder %s691_s20, 0  ;;  %p82_p3 = scmp.ne.s32.totalorder %s675_s16, %s671_s15 }
   0xa   : > { %s927_s23 = smov (%p34_p0, %s32_s23), 0  ;;  %p83_p5 = scmp.eq.s32.totalorder %s492_s21, 0 }
   0xb   : > { %p766_p4 = por %p77_p2, %p76_p1  ;;  %s64_s26 = ssub.s32 %s687_s19, %s927_s23 }
   0xc   : > { %p150_p6 = scmp.eq.s32.totalorder %s492_s21, 1  ;;  %p67_p7 = scmp.eq.s32.totalorder %s64_s26, 0 }
   0xd   : > { %p772_p8 = por %p83_p5, %p82_p3  ;;  %p156_p10 = scmp.eq.s32.totalorder %s493_s22, 1 }
   0xe   : > { %p776_p9 = por %p150_p6, %p76_p1  ;;  %p524_p13 = scmp.lt.s32.totalorder %s691_s20, 2 }
   0xf   : > { %s781_s29 = scalar_select %p67_p7, %s679_s17, %s69_s24  }
  0x10   : > { %p783_p11 = por %p156_p10, %p82_p3  ;;  %s193_s5 = sand.u32 1, %s679_s17  }
  0x11   : > { %s496_s6 = sshll.u32 %s193_s5, 5  ;;  %s509_s7 = sshll.u32 %s687_s19, 9 }
  0x12   : > { %s204_s10 = scalar_lea.hbm %s911_s1, %s509_s7  ;;  %s197_s11 = scalar_lea.vmem [#allocation2], %s496_s6 }
  0x13   : > { %s205_s12 = sshll.u32 %s197_s11, 4  ;;  %p796_p0 = pnand %p524_p13, %p766_p4  ;;  %s206_s12 = int_to_ptr.vmem [resolvable:$true] %s205_s12 }
  0x14   : > { %p499_p1 = scmp.ge.s32.totalorder %s691_s20, 1  ;;  %s194_s14 = scalar_lea.sflag [#allocation3], %s193_s5 }
  0x15   : > { %p585_p2 = pneg %p796_p0  ;;  %s596_s21 = scalar_lea.vmem %s206_s12, 512 }
  0x16   : > { %p597_p3 = scmp.ne.s32.totalorder %s206_s12, %s596_s21  ;;  %s693_s22 = smov [#allocation2]  }
  0x17   : > { %s601_s24 = sshll.u32 %s693_s22, 4  ;;  %s602_s24 = int_to_ptr.vmem [resolvable:$false] %s601_s24 }
  0x18   : > { %p599_p5 = pnand %p597_p3, %p585_p2  ;;  %s603_s26 = scalar_lea.vmem %s602_s24, 1024 }
  0x19   : > { %p604_p7 = scmp.lt.s32.totalorder %s206_s12, %s602_s24  ;;  %p605_p10 = scmp.lt.s32.totalorder %s603_s26, %s596_s21 }
  0x1a   : > { %p600_p6 = pneg %p599_p5 }
  0x1b   : > { %p606_p12 = por %p605_p10, %p604_p7 }
  0x1d   : > { %p607_p4 = pnand %p606_p12, %p600_p6 }
  0x1f   : > { %610 = shalt.err (!%p607_p4)
}
  0x20   : > { %s694_s25 = smov 128   ;;  %s695_s5 = smov 8  }
  0x21   : > { %519 = dma.hbm_to_vmem [thread:$0]  (!%p796_p0), %s204_s10, 512, %s206_s12, %s194_s14, %s694_s25, %s694_s25, %s695_s5  }
  0x22   : > { %p213_p13 = scmp.lt.s32.totalorder %s691_s20, 3 }
  0x24   : > { %p214_p2 = pnand %p499_p1, %p213_p13 }
  0x25   : > { %s809_s6 = sand.u32 (!%p214_p2), 1, %s675_s16  }
  0x26   : > { %217 = sbr.rel (%p214_p2) target bundleno = 200 (0xc8), region = 36  ;;  %s500_s7 = sshll.u32 (!%p214_p2), %s809_s6, 5 }
  0x27   : > { %s220_s8 = scalar_lea.sflag (!%p214_p2), [#allocation3], %s809_s6  ;;  %s815_s9 = scalar_lea.vmem (!%p214_p2), [#allocation2], %s500_s7 }
  0x2b   : > { %662 = dma.done.wait (%p772_p8), %s220_s8, 512  }
  0x2c   : > { %664 = vsyncadd (%p772_p8), %s220_s8, 4294966784  ;;  %v696_v0 = vmov 0   ;;  %v300_v1 = vld [vmem:[%s912_s2 + $0x10] sm:$0xff]  ;;  %v298_v2 = vld [vmem:[%s912_s2] sm:$0xff]  ;;  %p256_p8 = scmp.lt.s32.totalorder %s683_s18, 1  ;;  %s255_s24 = scalar_lea.vmem [#allocation5], %s500_s7 }
  0x2d   : > { %580 = vset.pattern.permute.xlu1 %v696_v0  ;;  %579 = vset.pattern.permute.xlu0 %v696_v0  ;;  %v301_v3 = vld [vmem:[%s912_s2 + $0x18] sm:$0xff]  ;;  %v299_v4 = vld [vmem:[%s912_s2 + $0x8] sm:$0xff]  ;;  %v302_v6 = vld [vmem:[%s913_s3] sm:$0xff]  ;;  %s389_s26 = sshll.u32 %s255_s24, 4  ;;  %s511_s25 = sshll.u32 %s683_s18, 9  ;;  %s857_s26 = int_to_ptr.vmem [resolvable:$true] %s389_s26 }
  0x2e   : > { %326 = vperm.xlu1 %580, %v300_v1   ;;  %316 = vperm.xlu0 %579, %v298_v2   ;;  %v303_v5 = vld [vmem:[%s913_s3 + $0x8] sm:$0xff]  ;;  %v305_v7 = vld [vmem:[%s913_s3 + $0x18] sm:$0xff]  ;;  %v304_v8 = vld [vmem:[%s913_s3 + $0x10] sm:$0xff]  ;;  %s257_s13 = scalar_select %p256_p8, %s683_s18, 1 }
  0x2f   : > { %v363_v56 = vld [vmem:[%s815_s9 + $0x8] sm:$0xff]  ;;  %v362_v58 = vld [vmem:[%s815_s9] sm:$0xff]  ;;  %v365_v2 = vld [vmem:[%s815_s9 + $0x18] sm:$0xff]  ;;  %s862_s8 = scalar_lea.hbm %s914_s4, %s511_s25  ;;  %s375_s18 = scalar_lea.sflag [#allocation4], %s809_s6 }
  0x30   : > { %s510_s14 = sshll.u32 %s257_s13, 5  ;;  %s697_s10 = smov [#allocation5]  }
  0x31   : > { %s263_s22 = scalar_lea.vmem %s910_s0, %s510_s14  ;;  %s615_s11 = sshll.u32 %s697_s10, 4  ;;  %s616_s11 = int_to_ptr.vmem [resolvable:$false] %s615_s11 }
  0x32   : > { %331 = vperm.xlu1 %580, %v301_v3   ;;  %321 = vperm.xlu0 %579, %v299_v4   ;;  %v264_v9 = vld [vmem:[%s263_s22] sm:$0xff]  ;;  %v265_v10 = vld [vmem:[%s263_s22 + $0x8] sm:$0xff]  ;;  %v266_v14 = vld [vmem:[%s263_s22 + $0x10] sm:$0xff]  ;;  %s617_s12 = scalar_lea.vmem %s616_s11, 1024  ;;  %p618_p3 = scmp.lt.s32.totalorder %s857_s26, %s616_s11 }
  0x33   : > { %v268_v11 = vadd.f32 %v265_v10, %v264_v9  ;;  %v279_v12 = vmul.f32 %v264_v9, %v264_v9  ;;  %v280_v13 = vmul.f32 %v265_v10, %v265_v10  ;;  %v281_v16 = vmul.f32 %v266_v14, %v266_v14  ;;  %v267_v18 = vld [vmem:[%s263_s22 + $0x18] sm:$0xff]  ;;  %v364_v4 = vld [vmem:[%s815_s9 + $0x10] sm:$0xff]  ;;  %s611_s9 = scalar_lea.vmem %s857_s26, 512 }
  0x34   : > { %v282_v20 = vmul.f32 %v267_v18, %v267_v18  ;;  %p612_p12 = scmp.ne.s32.totalorder %s857_s26, %s611_s9  ;;  %p619_p5 = scmp.lt.s32.totalorder %s617_s12, %s611_s9 }
  0x35   : > { %v269_v15 = vadd.f32 %v268_v11, %v266_v14  ;;  %v283_v17 = vadd.f32 %v280_v13, %v279_v12 }
  0x36   : > { %345 = vperm.xlu1 %580, %v303_v5   ;;  %340 = vperm.xlu0 %579, %v302_v6   ;;  %p613_p0 = pnand %p612_p12, %p776_p9  ;;  %p620_p6 = por %p619_p5, %p618_p3 }
  0x37   : > { %v270_v19 = vadd.f32 %v269_v15, %v267_v18  ;;  %v284_v21 = vadd.f32 %v283_v17, %v281_v16 }
  0x38   : > { %p614_p1 = pneg %p613_p0 }
  0x39   : > { %v271_v22 = vrot.slane %v270_v19, 4  ;;  %v285_v23 = vadd.f32 %v284_v21, %v282_v20 }
  0x3a   : > { %355 = vperm.xlu1 %580, %v305_v7   ;;  %350 = vperm.xlu0 %579, %v304_v8   ;;  %p621_p7 = pnand %p620_p6, %p614_p1 }
  0x3b   : > { %v272_v24 = vadd.f32 %v271_v22, %v270_v19  ;;  %v286_v25 = vrot.slane %v285_v23, 4 }
  0x3d   : > { %v273_v26 = vrot.slane %v272_v24, 2  ;;  %v287_v27 = vadd.f32 %v286_v25, %v285_v23 }
  0x3f   : > { %v274_v28 = vadd.f32 %v273_v26, %v272_v24  ;;  %v288_v29 = vrot.slane %v287_v27, 2 }
  0x41   : > { %v275_v30 = vrot.slane %v274_v28, 1  ;;  %v289_v31 = vadd.f32 %v288_v29, %v287_v27 }
  0x43   : > { %v276_v32 = vadd.f32 %v275_v30, %v274_v28  ;;  %v290_v33 = vrot.slane %v289_v31, 1 }
  0x45   : > { %v278_v34 = vmul.f32 0.03125, %v276_v32  ;;  %v291_v35 = vadd.f32 %v290_v33, %v289_v31 }
  0x47   : > { %v292_v36 = vmul.f32 0.03125, %v291_v35  ;;  %v293_v37 = vmul.f32 %v278_v34, %v278_v34  ;;  %v306_v41 = vsub.f32 %v264_v9, %v278_v34  ;;  %v307_v42 = vsub.f32 %v265_v10, %v278_v34 }
  0x48   : > { %v308_v46 = vsub.f32 %v266_v14, %v278_v34  ;;  %v309_v48 = vsub.f32 %v267_v18, %v278_v34 }
  0x49   : > { %v294_v38 = vsub.f32 %v292_v36, %v293_v37 }
  0x4b   : > { %v295_v39 = vmax.f32 %v294_v38, 0.0 }
  0x4d   : > { %v296_v40 = vadd.f32 1e-05, %v295_v39 }
  0x4f   : > { %581 = vrsqrt.f32 %v296_v40 }
  0x5c   : > { %v582_v43 = vpop.eup %581 }
  0x5d   : > { %v310_v47 = vmul.f32 %v582_v43, %v306_v41  ;;  %v311_v49 = vmul.f32 %v582_v43, %v307_v42  ;;  %v312_v52 = vmul.f32 %v582_v43, %v308_v46  ;;  %v313_v54 = vmul.f32 %v582_v43, %v309_v48 }
  0xa9   : > { %v327_v44 = vpop.permute.xlu1 %326  ;;  %v317_v45 = vpop.permute.xlu0 %316 }
  0xaa   : > { %v334_v53 = vmul.f32 %v317_v45, %v310_v47  ;;  %v336_v62 = vmul.f32 %v327_v44, %v312_v52 }
  0xad   : > { %v332_v50 = vpop.permute.xlu1 %331  ;;  %v322_v51 = vpop.permute.xlu0 %321 }
  0xae   : > { %v335_v55 = vmul.f32 %v322_v51, %v311_v49  ;;  %v337_v63 = vmul.f32 %v332_v50, %v313_v54 }
  0xb1   : > { %v346_v57 = vpop.permute.xlu1 %345  ;;  %v341_v59 = vpop.permute.xlu0 %340 }
  0xb2   : > { %v359_v60 = vadd.f32 %v346_v57, %v335_v55  ;;  %v358_v61 = vadd.f32 %v341_v59, %v334_v53 }
  0xb4   : > { %v367_v0 = vadd.f32 %v363_v56, %v359_v60  ;;  %v366_v1 = vadd.f32 %v362_v58, %v358_v61 }
  0xb5   : > { %v356_v3 = vpop.permute.xlu1 %355  ;;  %v351_v5 = vpop.permute.xlu0 %350 }
  0xb6   : > { %371 = vst [vmem:[%s255_s24 + $0x8] sm:$0xff] %v367_v0  ;;  %370 = vst [vmem:[%s255_s24] sm:$0xff] %v366_v1  ;;  %v361_v6 = vadd.f32 %v356_v3, %v337_v63  ;;  %v360_v7 = vadd.f32 %v351_v5, %v336_v62 }
  0xb8   : > { %v369_v8 = vadd.f32 %v365_v2, %v361_v6  ;;  %v368_v9 = vadd.f32 %v364_v4, %v360_v7 }
  0xba   : > { %373 = vst [vmem:[%s255_s24 + $0x18] sm:$0xff] %v369_v8  ;;  %372 = vst [vmem:[%s255_s24 + $0x10] sm:$0xff] %v368_v9 }
  0xbb   : > { %624 = shalt.err (!%p621_p7)
}
  0xbc   : > { %s625_s13 = scalar_lea.hbm %s862_s8, 512  ;;  %s629_s27 = scalar_lea.hbm %s914_s4, 1024 }
  0xbd   : > { %p626_p10 = scmp.ne.s32.totalorder %s862_s8, %s625_s13  ;;  %p630_p2 = scmp.lt.s32.totalorder %s862_s8, %s914_s4 }
  0xbe   : > { %p631_p8 = scmp.lt.s32.totalorder %s629_s27, %s625_s13 }
  0xbf   : > { %p627_p4 = pnand %p626_p10, %p776_p9 }
  0xc0   : > { %p632_p12 = por %p631_p8, %p630_p2 }
  0xc1   : > { %p628_p13 = pneg %p627_p4 }
  0xc3   : > { %p633_p0 = pnand %p632_p12, %p628_p13 }
  0xc5   : > { %636 = shalt.err (!%p633_p0)
}
  0xc6   : > { %s698_s25 = smov 128   ;;  %s699_s7 = smov 8  }
  0xc7   : > { %514 = dma.vmem_to_hbm [thread:$0]  (%p776_p9), %s857_s26, 512, %s862_s8, %s375_s18, %s698_s25, %s698_s25, %s699_s7  }
  0xc8 PF: > { %s404_s5 = sand.u32 1, %s671_s15   ;;  %p920_p1 = scmp.ge.s32.totalorder %s691_s20, 2 }
  0xc9   : > { %s405_s9 = scalar_lea.sflag [#allocation4], %s404_s5 }
  0xca   : > { %p521_p3 = pnand %p920_p1, %p783_p11 }
  0xcc   : > { %p522_p5 = pneg %p521_p3 }
  0xce   : > { %666 = dma.done.wait (%p522_p5), %s405_s9, 512  }
  0xcf   : > { %668 = vsyncadd (%p522_p5), %s405_s9, 4294966784  ;;  %s20_s20 = sadd.s32 1, %s691_s20   ;;  %s921_s15 = smov %s675_s16 }
  0xd0   : > { %p17_p6 = scmp.ge.s32.totalorder %s20_s20, 4   ;;  %s922_s16 = smov %s679_s17 }
  0xd1   : > { %s923_s17 = smov %s781_s29  ;;  %s924_s18 = smov %s687_s19 }
  0xd2   : > { %s925_s19 = smov %s927_s23  ;;  %19 = sbr.rel (!%p17_p6) target bundleno = 6 (0x6), region = 84 }
  0xd7   :  { %410 = vsyncpa [#allocation3], 1 }
  0xd8   :  { %412 = vsyncpa [#allocation3 + $0x1], 1 }
  0xd9   :  { %413 = vsyncpa [#allocation4], 1 }
  0xda   :  { %415 = vsyncpa [#allocation4 + $0x1], 1 }

</bundles_post_ra>
